<compile_context>
chip_gen: v7x
topology: tpu7x:2x2x1
jax: 0.10.0
libtpu: 0.0.40
codegen_flags: <defaults>
</compile_context>

<pallas_src>
import jax
import jax.numpy as jnp
from jax import lax
from jax.experimental import pallas as pl
from jax.experimental.pallas import tpu as pltpu

NUM_CLASSES = 4
C_PRED = 5 + NUM_CLASSES      # [obj, x, y, w, h, class logits...]
C_TGT = 6                     # [obj, x, y, w, h, class idx]
LANES = 128

LAMBDA_BOX = 5.0
LAMBDA_OBJ = 1.0
LAMBDA_NOOBJ = 1.0
LAMBDA_CLASS = 1.0


def _sigmoid(x):
    return 1.0 / (1.0 + jnp.exp(-x))


def _fast_recip(x):
    """EUP vrcp (approx) + one Newton step -> ~f32-exact 1/x, cheap on VPU."""
    r = pl.reciprocal(x, approx=True)
    return r * (2.0 - x * r)


def _stable_sigmoid(x):
    """Overflow-safe sigmoid: 1+exp(-|x|) is in [1,2], so the recip never sees inf."""
    e = jnp.exp(-jnp.abs(x))
    inv = _fast_recip(1.0 + e)
    return jnp.where(x >= 0.0, inv, e * inv)


def _yolo_partials_kernel(anc_ref, pred_ref, tgt_ref, out_ref):
    a = pl.program_id(0)          # anchor index

    # Tiny SMEM anchor table: [w, h, 1/w, 1/h] per anchor.
    aw = anc_ref[a, 0]
    ah = anc_ref[a, 1]
    iaw = anc_ref[a, 2]
    iah = anc_ref[a, 3]

    # Per-channel lane-dense slabs (tr, 128), loaded at point of use.
    # Padded rows carry t0 == -1 (neither obj nor noobj), so no iota mask.
    t0 = tgt_ref[0, 0, :, :].astype(jnp.float32)
    obj = t0 == 1.0
    noobj = t0 == 0.0
    zeros = jnp.zeros_like(t0)

    # ---------------- no-object loss: BCEWithLogits vs zero target ---------
    x = pred_ref[0, 0, :, :].astype(jnp.float32)
    e0 = jnp.exp(-jnp.abs(x))                          # shared with sigmoid(x)
    bce = jnp.maximum(x, 0.0) + jnp.log(1.0 + e0)
    s_noobj = jnp.sum(jnp.where(noobj, bce, zeros), keepdims=True)
    c_noobj = jnp.sum(jnp.where(noobj, 1.0, 0.0), keepdims=True)

    # ---------------- object loss: MSE(sigmoid(p0), iou * t0) --------------
    inv0 = _fast_recip(1.0 + e0)
    sig0 = jnp.where(x >= 0.0, inv0, e0 * inv0)         # sigmoid from shared e0

    sx = _stable_sigmoid(pred_ref[0, 1, :, :].astype(jnp.float32))
    sy = _stable_sigmoid(pred_ref[0, 2, :, :].astype(jnp.float32))
    p3 = pred_ref[0, 3, :, :].astype(jnp.float32)
    p4 = pred_ref[0, 4, :, :].astype(jnp.float32)
    bw = jnp.exp(p3) * aw
    bh = jnp.exp(p4) * ah

    tx = tgt_ref[0, 1, :, :].astype(jnp.float32)
    ty = tgt_ref[0, 2, :, :].astype(jnp.float32)
    tw = tgt_ref[0, 3, :, :].astype(jnp.float32)
    th = tgt_ref[0, 4, :, :].astype(jnp.float32)

    # midpoint-format IoU (forward math identical to the torch helper)
    b1x1 = sx - 0.5 * bw
    b1x2 = sx + 0.5 * bw
    b1y1 = sy - 0.5 * bh
    b1y2 = sy + 0.5 * bh
    b2x1 = tx - 0.5 * tw
    b2x2 = tx + 0.5 * tw
    b2y1 = ty - 0.5 * th
    b2y2 = ty + 0.5 * th
    iw = jnp.maximum(jnp.minimum(b1x2, b2x2) - jnp.maximum(b1x1, b2x1), 0.0)
    ih = jnp.maximum(jnp.minimum(b1y2, b2y2) - jnp.maximum(b1y1, b2y1), 0.0)
    inter = iw * ih
    area1 = jnp.abs((b1x2 - b1x1) * (b1y2 - b1y1))
    area2 = jnp.abs((b2x2 - b2x1) * (b2y2 - b2y1))
    iou = inter * _fast_recip(area1 + area2 - inter + 1e-6)

    obj_err = (sig0 - iou * t0) ** 2
    s_obj = jnp.sum(jnp.where(obj, obj_err, zeros), keepdims=True)
    c_obj = jnp.sum(jnp.where(obj, 1.0, 0.0), keepdims=True)

    # ---------------- box loss (channel-wise, no concatenates) -------------
    twl = jnp.log(1e-16 + tw * iaw)
    thl = jnp.log(1e-16 + th * iah)
    box_err = ((sx - tx) ** 2 + (sy - ty) ** 2
               + (p3 - twl) ** 2 + (p4 - thl) ** 2)
    s_box = jnp.sum(jnp.where(obj, box_err, zeros), keepdims=True)

    # ---------------- class loss: cross-entropy over logits 5: -------------
    logits = [pred_ref[0, 5 + k, :, :].astype(jnp.float32)
              for k in range(NUM_CLASSES)]
    m = logits[0]
    for k in range(1, NUM_CLASSES):
        m = jnp.maximum(m, logits[k])
    sum_exp = jnp.exp(logits[0] - m)
    for k in range(1, NUM_CLASSES):
        sum_exp = sum_exp + jnp.exp(logits[k] - m)
    lse = m + jnp.log(sum_exp)
    label = tgt_ref[0, 5, :, :].astype(jnp.float32)
    picked = jnp.where(label == 0.0, logits[0], zeros)
    for k in range(1, NUM_CLASSES):
        picked = picked + jnp.where(label == float(k), logits[k], zeros)
    ce = lse - picked
    s_class = jnp.sum(jnp.where(obj, ce, zeros), keepdims=True)

    # ---------------- emit per-tile partials (lane-indexed (8,128) slab) ---
    lane8 = lax.broadcasted_iota(jnp.int32, (8, LANES), 1)
    packed = (jnp.where(lane8 == 0, s_noobj, 0.0)
              + jnp.where(lane8 == 1, c_noobj, 0.0)
              + jnp.where(lane8 == 2, s_obj, 0.0)
              + jnp.where(lane8 == 3, c_obj, 0.0)
              + jnp.where(lane8 == 4, s_box, 0.0)
              + jnp.where(lane8 == 5, s_class, 0.0))
    out_ref[...] = packed[None, None]


def _round_up(x, m):
    return -(-x // m) * m


def _default_tiling():
    """(max_block_rows, vmem_limit_bytes) tuned per TPU generation."""
    try:
        vmem = int(pltpu.get_tpu_info().vmem_capacity_bytes)
    except Exception:
        vmem = 64 * 1024 * 1024            # conservative fallback
    if vmem >= 100 * 1024 * 1024:          # v5e / v6e: 128 MiB VMEM per core
        return 2048, 64 * 1024 * 1024
    return 512, 32 * 1024 * 1024           # v7x: 64 MiB VMEM per core


def yolo_loss_pallas(predictions, target, anchors, *,
                     max_block_rows=None, vmem_limit_bytes=None):
    """predictions: (B, 3, S, S, 5+NC), target: (B, 3, S, S, 6), anchors: (3, 2)."""
    B, A, S, S2, C = predictions.shape
    assert C == C_PRED and S == S2 and target.shape == (B, A, S, S, C_TGT)
    rows = B * S * S
    nr = -(-rows // LANES)                 # 128-lane sublane groups per anchor

    if max_block_rows is None or vmem_limit_bytes is None:
        mbr, vlb = _default_tiling()
        max_block_rows = max_block_rows or mbr
        vmem_limit_bytes = vmem_limit_bytes or vlb

    # Row-axis tiling.  Keep the number of tiles even (>=2 when the problem is
    # big enough) so grid programs balance across v7x's two TensorCores; this
    # only costs a negligible extra grid step on single-core v5e/v6e.
    if nr >= 16:
        num_tiles = max(2, -(-nr // max_block_rows))
        if num_tiles % 2:
            num_tiles += 1
        tr = _round_up(-(-nr // num_tiles), 8)
    else:
        num_tiles = 1
        tr = nr
    padded_nr = num_tiles * tr
    pad = padded_nr * LANES - rows

    # Anchor-major / channel-major relayout as one fused expression per tensor;
    # allow_input_fusion below lets XLA fold it into the pallas operand reads.
    pred_r = jnp.transpose(predictions, (1, 4, 0, 2, 3)).reshape(A, C_PRED, rows)
    tgt_r = jnp.transpose(target, (1, 4, 0, 2, 3)).reshape(A, C_TGT, rows)
    if pad:
        pred_r = jnp.pad(pred_r, ((0, 0), (0, 0), (0, pad)))
        # Target pad value -1: padded rows are neither obj nor noobj, so no
        # in-kernel row-validity mask is needed.
        tgt_r = jnp.pad(tgt_r, ((0, 0), (0, 0), (0, pad)), constant_values=-1.0)
    pred4 = pred_r.reshape(A, C_PRED, padded_nr, LANES)
    tgt4 = tgt_r.reshape(A, C_TGT, padded_nr, LANES)

    # Tiny SMEM anchor table: [w, h, 1/w, 1/h] per anchor.
    anc = anchors.astype(jnp.float32)
    anc_tbl = jnp.concatenate([anc, 1.0 / anc], axis=1)        # (A, 4)

    partials = pl.pallas_call(
        _yolo_partials_kernel,
        out_shape=jax.ShapeDtypeStruct((A, num_tiles, 8, LANES), jnp.float32),
        grid=(A, num_tiles),
        in_specs=[
            pl.BlockSpec(memory_space=pltpu.MemorySpace.SMEM),            # anchors
            pl.BlockSpec((1, C_PRED, tr, LANES), lambda a, i: (a, 0, i, 0)),
            pl.BlockSpec((1, C_TGT, tr, LANES), lambda a, i: (a, 0, i, 0)),
        ],
        out_specs=pl.BlockSpec((1, 1, 8, LANES), lambda a, i: (a, i, 0, 0)),
        compiler_params=pltpu.CompilerParams(
            dimension_semantics=("parallel", "parallel"),
            allow_input_fusion=[False, True, True],
            vmem_limit_bytes=vmem_limit_bytes),
    )(anc_tbl, pred4, tgt4)

    # Finalize (tiny scalar math) in plain JAX.
    tot = jnp.sum(partials[:, :, 0, :], axis=(0, 1))            # (128,)
    s_noobj, c_noobj = tot[0], tot[1]
    s_obj, c_obj = tot[2], tot[3]
    s_box, s_class = tot[4], tot[5]

    # NOTE: like the PyTorch module, a batch with zero objects yields NaN here.
    no_object_loss = s_noobj / c_noobj
    object_loss = s_obj / c_obj
    box_loss = s_box / (4.0 * c_obj) + 1e-16
    class_loss = s_class / c_obj
    return (LAMBDA_BOX * box_loss + LAMBDA_OBJ * object_loss
            + LAMBDA_NOOBJ * no_object_loss + LAMBDA_CLASS * class_loss)


def yolo_loss_ref(pred, tgt, anchors):
    """Pure-JAX reference reproducing the PyTorch forward semantics."""
    anc = anchors.reshape(1, 3, 1, 1, 2)
    t0 = tgt[..., 0:1]
    obj = t0 == 1.0
    noobj = t0 == 0.0

    x = pred[..., 0:1]
    bce = jnp.maximum(x, 0.0) - x * t0 + jnp.log(1.0 + jnp.exp(-jnp.abs(x)))
    no_object_loss = jnp.sum(jnp.where(noobj, bce, 0.0)) / jnp.sum(noobj)

    sig_xy = _sigmoid(pred[..., 1:3])
    bwh = jnp.exp(pred[..., 3:5]) * anc
    b1_x1 = sig_xy[..., 0:1] - bwh[..., 0:1] / 2
    b1_y1 = sig_xy[..., 1:2] - bwh[..., 1:2] / 2
    b1_x2 = sig_xy[..., 0:1] + bwh[..., 0:1] / 2
    b1_y2 = sig_xy[..., 1:2] + bwh[..., 1:2] / 2
    b2_x1 = tgt[..., 1:2] - tgt[..., 3:4] / 2
    b2_y1 = tgt[..., 2:3] - tgt[..., 4:5] / 2
    b2_x2 = tgt[..., 1:2] + tgt[..., 3:4] / 2
    b2_y2 = tgt[..., 2:3] + tgt[..., 4:5] / 2
    inter = (jnp.maximum(jnp.minimum(b1_x2, b2_x2) - jnp.maximum(b1_x1, b2_x1), 0.0)
             * jnp.maximum(jnp.minimum(b1_y2, b2_y2) - jnp.maximum(b1_y1, b2_y1), 0.0))
    a1 = jnp.abs((b1_x2 - b1_x1) * (b1_y2 - b1_y1))
    a2 = jnp.abs((b2_x2 - b2_x1) * (b2_y2 - b2_y1))
    iou = inter / (a1 + a2 - inter + 1e-6)

    n_obj = jnp.sum(obj)
    object_loss = jnp.sum(jnp.where(obj, (_sigmoid(x) - iou * t0) ** 2, 0.0)) / n_obj

    pred_box = jnp.concatenate([sig_xy, pred[..., 3:5]], -1)
    tgt_box = jnp.concatenate([tgt[..., 1:3], jnp.log(1e-16 + tgt[..., 3:5] / anc)], -1)
    box_loss = jnp.sum(jnp.where(obj, (pred_box - tgt_box) ** 2, 0.0)) / (4.0 * n_obj) + 1e-16

    logits = pred[..., 5:]
    m = jnp.max(logits, -1, keepdims=True)
    lse = m + jnp.log(jnp.sum(jnp.exp(logits - m), -1, keepdims=True))
    lbl = tgt[..., 5:6]
    col = lax.broadcasted_iota(jnp.float32, logits.shape, logits.ndim - 1)
    picked = jnp.sum(jnp.where(col == lbl, logits, 0.0), -1, keepdims=True)
    class_loss = jnp.sum(jnp.where(obj, lse - picked, 0.0)) / n_obj

    return (LAMBDA_BOX * box_loss + LAMBDA_OBJ * object_loss
            + LAMBDA_NOOBJ * no_object_loss + LAMBDA_CLASS * class_loss)


if __name__ == "__main__":
    B, A, S = 2, 3, 8
    key = jax.random.PRNGKey(0)
    k1, k2, k3, k4, k5, k6 = jax.random.split(key, 6)

    predictions = 0.5 * jax.random.normal(k1, (B, A, S, S, C_PRED), jnp.float32)
    t0 = (jax.random.uniform(k2, (B, A, S, S, 1)) < 0.3).astype(jnp.float32)
    xy = jax.random.uniform(k3, (B, A, S, S, 2), jnp.float32)
    wh = jax.random.uniform(k4, (B, A, S, S, 2), jnp.float32, 0.05, 1.5)
    cls = jax.random.randint(k5, (B, A, S, S, 1), 0, NUM_CLASSES).astype(jnp.float32)
    target = jnp.concatenate([t0, xy, wh, cls], axis=-1)
    anchors = jax.random.uniform(k6, (A, 2), jnp.float32, 0.2, 1.0)

    loss_fn = jax.jit(yolo_loss_pallas)
    loss = jax.block_until_ready(loss_fn(predictions, target, anchors))
    ref = yolo_loss_ref(predictions, target, anchors)

    assert jnp.isfinite(loss), f"non-finite loss: {loss}"
    assert jnp.allclose(loss, ref, rtol=2e-4, atol=2e-4), (loss, ref)
    print("KERNEL_OK")
</pallas_src>

<mosaic_0001>
module attributes {stable_mosaic.version = 11 : i64} {
  func.func @_yolo_partials_kernel(%arg0: i32, %arg1: i32, %arg2: memref<3x4xf32, #tpu.memory_space<smem>>, %arg3: memref<1x9x1x128xf32, #tpu.memory_space<vmem>>, %arg4: memref<1x6x1x128xf32, #tpu.memory_space<vmem>>, %arg5: memref<1x1x8x128xf32, #tpu.memory_space<vmem>>) attributes {dimension_semantics = [#tpu.dimension_semantics<parallel>, #tpu.dimension_semantics<parallel>], iteration_bounds = array<i64: 3, 1>, scalar_prefetch = 0 : i64, scratch_operands = 0 : i64, tpu.core_type = #tpu.core_type<tc>, window_params = [{transform_indices = @transform_0, window_bounds = array<i64: 3, 4>}, {transform_indices = @transform_1, window_bounds = array<i64: 1, 9, 1, 128>}, {transform_indices = @transform_2, window_bounds = array<i64: 1, 6, 1, 128>}, {transform_indices = @transform_3, window_bounds = array<i64: 1, 1, 8, 128>}]} {
    %0 = arith.index_cast %arg0 : i32 to index
    %c0 = arith.constant 0 : index
    %1 = memref.load %arg2[%0, %c0] : memref<3x4xf32, #tpu.memory_space<smem>>
    %2 = arith.index_cast %arg0 : i32 to index
    %c1 = arith.constant 1 : index
    %3 = memref.load %arg2[%2, %c1] : memref<3x4xf32, #tpu.memory_space<smem>>
    %4 = arith.index_cast %arg0 : i32 to index
    %c2 = arith.constant 2 : index
    %5 = memref.load %arg2[%4, %c2] : memref<3x4xf32, #tpu.memory_space<smem>>
    %6 = arith.index_cast %arg0 : i32 to index
    %c3 = arith.constant 3 : index
    %7 = memref.load %arg2[%6, %c3] : memref<3x4xf32, #tpu.memory_space<smem>>
    %c0_0 = arith.constant 0 : index
    %c0_1 = arith.constant 0 : index
    %c0_2 = arith.constant 0 : index
    %c0_3 = arith.constant 0 : index
    %8 = vector.load %arg4[%c0_0, %c0_1, %c0_2, %c0_3] : memref<1x6x1x128xf32, #tpu.memory_space<vmem>>, vector<1x1x1x128xf32>
    %9 = vector.shape_cast %8 : vector<1x1x1x128xf32> to vector<1x128xf32>
    %cst = arith.constant 1.000000e+00 : f32
    %10 = vector.broadcast %cst : f32 to vector<1x128xf32>
    %11 = arith.cmpf oeq, %9, %10 : vector<1x128xf32>
    %cst_4 = arith.constant 0.000000e+00 : f32
    %12 = vector.broadcast %cst_4 : f32 to vector<1x128xf32>
    %13 = arith.cmpf oeq, %9, %12 : vector<1x128xf32>
    %cst_5 = arith.constant 0.000000e+00 : f32
    %14 = vector.broadcast %cst_5 : f32 to vector<1x128xf32>
    %c0_6 = arith.constant 0 : index
    %c0_7 = arith.constant 0 : index
    %c0_8 = arith.constant 0 : index
    %c0_9 = arith.constant 0 : index
    %15 = vector.load %arg3[%c0_6, %c0_7, %c0_8, %c0_9] : memref<1x9x1x128xf32, #tpu.memory_space<vmem>>, vector<1x1x1x128xf32>
    %16 = vector.shape_cast %15 : vector<1x1x1x128xf32> to vector<1x128xf32>
    %17 = math.absf %16 : vector<1x128xf32>
    %cst_10 = arith.constant 0.000000e+00 : f32
    %18 = vector.broadcast %cst_10 : f32 to vector<1x128xf32>
    %19 = arith.subf %18, %17 : vector<1x128xf32>
    %20 = math.exp %19 : vector<1x128xf32>
    %cst_11 = arith.constant 0.000000e+00 : f32
    %21 = vector.broadcast %cst_11 : f32 to vector<1x128xf32>
    %22 = arith.maximumf %16, %21 : vector<1x128xf32>
    %cst_12 = arith.constant 1.000000e+00 : f32
    %23 = vector.broadcast %cst_12 : f32 to vector<1x128xf32>
    %24 = arith.addf %23, %20 : vector<1x128xf32>
    %25 = math.log %24 : vector<1x128xf32>
    %26 = arith.addf %22, %25 : vector<1x128xf32>
    %27 = arith.select %13, %26, %14 : vector<1x128xi1>, vector<1x128xf32>
    %28 = vector.shape_cast %27 : vector<1x128xf32> to vector<1x1x128xf32>
    %cst_13 = arith.constant dense<0.000000e+00> : vector<1xf32>
    %29 = vector.multi_reduction <add>, %28, %cst_13 [1, 2] : vector<1x1x128xf32> to vector<1xf32>
    %30 = vector.shape_cast %29 : vector<1xf32> to vector<1x1x1xf32>
    %31 = vector.extract %30[0, 0, 0] : f32 from vector<1x1x1xf32>
    %32 = vector.broadcast %31 : f32 to vector<1x1xf32>
    %cst_14 = arith.constant 1.000000e+00 : f32
    %cst_15 = arith.constant 0.000000e+00 : f32
    %33 = vector.broadcast %cst_14 : f32 to vector<1x128xf32>
    %34 = vector.broadcast %cst_15 : f32 to vector<1x128xf32>
    %35 = arith.select %13, %33, %34 : vector<1x128xi1>, vector<1x128xf32>
    %36 = vector.shape_cast %35 : vector<1x128xf32> to vector<1x1x128xf32>
    %cst_16 = arith.constant dense<0.000000e+00> : vector<1xf32>
    %37 = vector.multi_reduction <add>, %36, %cst_16 [1, 2] : vector<1x1x128xf32> to vector<1xf32>
    %38 = vector.shape_cast %37 : vector<1xf32> to vector<1x1x1xf32>
    %39 = vector.extract %38[0, 0, 0] : f32 from vector<1x1x1xf32>
    %40 = vector.broadcast %39 : f32 to vector<1x1xf32>
    %cst_17 = arith.constant 1.000000e+00 : f32
    %41 = vector.broadcast %cst_17 : f32 to vector<1x128xf32>
    %42 = arith.addf %41, %20 : vector<1x128xf32>
    %43 = tpu.reciprocal %42 {approx = true} : vector<1x128xf32> -> vector<1x128xf32>
    %44 = arith.mulf %42, %43 : vector<1x128xf32>
    %cst_18 = arith.constant 2.000000e+00 : f32
    %45 = vector.broadcast %cst_18 : f32 to vector<1x128xf32>
    %46 = arith.subf %45, %44 : vector<1x128xf32>
    %47 = arith.mulf %43, %46 : vector<1x128xf32>
    %cst_19 = arith.constant 0.000000e+00 : f32
    %48 = vector.broadcast %cst_19 : f32 to vector<1x128xf32>
    %49 = arith.cmpf oge, %16, %48 : vector<1x128xf32>
    %50 = arith.mulf %20, %47 : vector<1x128xf32>
    %51 = arith.select %49, %47, %50 : vector<1x128xi1>, vector<1x128xf32>
    %c0_20 = arith.constant 0 : index
    %c1_21 = arith.constant 1 : index
    %c0_22 = arith.constant 0 : index
    %c0_23 = arith.constant 0 : index
    %52 = vector.load %arg3[%c0_20, %c1_21, %c0_22, %c0_23] : memref<1x9x1x128xf32, #tpu.memory_space<vmem>>, vector<1x1x1x128xf32>
    %53 = vector.shape_cast %52 : vector<1x1x1x128xf32> to vector<1x128xf32>
    %54 = math.absf %53 : vector<1x128xf32>
    %cst_24 = arith.constant 0.000000e+00 : f32
    %55 = vector.broadcast %cst_24 : f32 to vector<1x128xf32>
    %56 = arith.subf %55, %54 : vector<1x128xf32>
    %57 = math.exp %56 : vector<1x128xf32>
    %cst_25 = arith.constant 1.000000e+00 : f32
    %58 = vector.broadcast %cst_25 : f32 to vector<1x128xf32>
    %59 = arith.addf %58, %57 : vector<1x128xf32>
    %60 = tpu.reciprocal %59 {approx = true} : vector<1x128xf32> -> vector<1x128xf32>
    %61 = arith.mulf %59, %60 : vector<1x128xf32>
    %cst_26 = arith.constant 2.000000e+00 : f32
    %62 = vector.broadcast %cst_26 : f32 to vector<1x128xf32>
    %63 = arith.subf %62, %61 : vector<1x128xf32>
    %64 = arith.mulf %60, %63 : vector<1x128xf32>
    %cst_27 = arith.constant 0.000000e+00 : f32
    %65 = vector.broadcast %cst_27 : f32 to vector<1x128xf32>
    %66 = arith.cmpf oge, %53, %65 : vector<1x128xf32>
    %67 = arith.mulf %57, %64 : vector<1x128xf32>
    %68 = arith.select %66, %64, %67 : vector<1x128xi1>, vector<1x128xf32>
    %c0_28 = arith.constant 0 : index
    %c2_29 = arith.constant 2 : index
    %c0_30 = arith.constant 0 : index
    %c0_31 = arith.constant 0 : index
    %69 = vector.load %arg3[%c0_28, %c2_29, %c0_30, %c0_31] : memref<1x9x1x128xf32, #tpu.memory_space<vmem>>, vector<1x1x1x128xf32>
    %70 = vector.shape_cast %69 : vector<1x1x1x128xf32> to vector<1x128xf32>
    %71 = math.absf %70 : vector<1x128xf32>
    %cst_32 = arith.constant 0.000000e+00 : f32
    %72 = vector.broadcast %cst_32 : f32 to vector<1x128xf32>
    %73 = arith.subf %72, %71 : vector<1x128xf32>
    %74 = math.exp %73 : vector<1x128xf32>
    %cst_33 = arith.constant 1.000000e+00 : f32
    %75 = vector.broadcast %cst_33 : f32 to vector<1x128xf32>
    %76 = arith.addf %75, %74 : vector<1x128xf32>
    %77 = tpu.reciprocal %76 {approx = true} : vector<1x128xf32> -> vector<1x128xf32>
    %78 = arith.mulf %76, %77 : vector<1x128xf32>
    %cst_34 = arith.constant 2.000000e+00 : f32
    %79 = vector.broadcast %cst_34 : f32 to vector<1x128xf32>
    %80 = arith.subf %79, %78 : vector<1x128xf32>
    %81 = arith.mulf %77, %80 : vector<1x128xf32>
    %cst_35 = arith.constant 0.000000e+00 : f32
    %82 = vector.broadcast %cst_35 : f32 to vector<1x128xf32>
    %83 = arith.cmpf oge, %70, %82 : vector<1x128xf32>
    %84 = arith.mulf %74, %81 : vector<1x128xf32>
    %85 = arith.select %83, %81, %84 : vector<1x128xi1>, vector<1x128xf32>
    %c0_36 = arith.constant 0 : index
    %c3_37 = arith.constant 3 : index
    %c0_38 = arith.constant 0 : index
    %c0_39 = arith.constant 0 : index
    %86 = vector.load %arg3[%c0_36, %c3_37, %c0_38, %c0_39] : memref<1x9x1x128xf32, #tpu.memory_space<vmem>>, vector<1x1x1x128xf32>
    %87 = vector.shape_cast %86 : vector<1x1x1x128xf32> to vector<1x128xf32>
    %c0_40 = arith.constant 0 : index
    %c4 = arith.constant 4 : index
    %c0_41 = arith.constant 0 : index
    %c0_42 = arith.constant 0 : index
    %88 = vector.load %arg3[%c0_40, %c4, %c0_41, %c0_42] : memref<1x9x1x128xf32, #tpu.memory_space<vmem>>, vector<1x1x1x128xf32>
    %89 = vector.shape_cast %88 : vector<1x1x1x128xf32> to vector<1x128xf32>
    %90 = math.exp %87 : vector<1x128xf32>
    %91 = vector.broadcast %1 : f32 to vector<1x128xf32>
    %92 = arith.mulf %90, %91 : vector<1x128xf32>
    %93 = math.exp %89 : vector<1x128xf32>
    %94 = vector.broadcast %3 : f32 to vector<1x128xf32>
    %95 = arith.mulf %93, %94 : vector<1x128xf32>
    %c0_43 = arith.constant 0 : index
    %c1_44 = arith.constant 1 : index
    %c0_45 = arith.constant 0 : index
    %c0_46 = arith.constant 0 : index
    %96 = vector.load %arg4[%c0_43, %c1_44, %c0_45, %c0_46] : memref<1x6x1x128xf32, #tpu.memory_space<vmem>>, vector<1x1x1x128xf32>
    %97 = vector.shape_cast %96 : vector<1x1x1x128xf32> to vector<1x128xf32>
    %c0_47 = arith.constant 0 : index
    %c2_48 = arith.constant 2 : index
    %c0_49 = arith.constant 0 : index
    %c0_50 = arith.constant 0 : index
    %98 = vector.load %arg4[%c0_47, %c2_48, %c0_49, %c0_50] : memref<1x6x1x128xf32, #tpu.memory_space<vmem>>, vector<1x1x1x128xf32>
    %99 = vector.shape_cast %98 : vector<1x1x1x128xf32> to vector<1x128xf32>
    %c0_51 = arith.constant 0 : index
    %c3_52 = arith.constant 3 : index
    %c0_53 = arith.constant 0 : index
    %c0_54 = arith.constant 0 : index
    %100 = vector.load %arg4[%c0_51, %c3_52, %c0_53, %c0_54] : memref<1x6x1x128xf32, #tpu.memory_space<vmem>>, vector<1x1x1x128xf32>
    %101 = vector.shape_cast %100 : vector<1x1x1x128xf32> to vector<1x128xf32>
    %c0_55 = arith.constant 0 : index
    %c4_56 = arith.constant 4 : index
    %c0_57 = arith.constant 0 : index
    %c0_58 = arith.constant 0 : index
    %102 = vector.load %arg4[%c0_55, %c4_56, %c0_57, %c0_58] : memref<1x6x1x128xf32, #tpu.memory_space<vmem>>, vector<1x1x1x128xf32>
    %103 = vector.shape_cast %102 : vector<1x1x1x128xf32> to vector<1x128xf32>
    %cst_59 = arith.constant 5.000000e-01 : f32
    %104 = vector.broadcast %cst_59 : f32 to vector<1x128xf32>
    %105 = arith.mulf %104, %92 : vector<1x128xf32>
    %106 = arith.subf %68, %105 : vector<1x128xf32>
    %cst_60 = arith.constant 5.000000e-01 : f32
    %107 = vector.broadcast %cst_60 : f32 to vector<1x128xf32>
    %108 = arith.mulf %107, %92 : vector<1x128xf32>
    %109 = arith.addf %68, %108 : vector<1x128xf32>
    %cst_61 = arith.constant 5.000000e-01 : f32
    %110 = vector.broadcast %cst_61 : f32 to vector<1x128xf32>
    %111 = arith.mulf %110, %95 : vector<1x128xf32>
    %112 = arith.subf %85, %111 : vector<1x128xf32>
    %cst_62 = arith.constant 5.000000e-01 : f32
    %113 = vector.broadcast %cst_62 : f32 to vector<1x128xf32>
    %114 = arith.mulf %113, %95 : vector<1x128xf32>
    %115 = arith.addf %85, %114 : vector<1x128xf32>
    %cst_63 = arith.constant 5.000000e-01 : f32
    %116 = vector.broadcast %cst_63 : f32 to vector<1x128xf32>
    %117 = arith.mulf %116, %101 : vector<1x128xf32>
    %118 = arith.subf %97, %117 : vector<1x128xf32>
    %cst_64 = arith.constant 5.000000e-01 : f32
    %119 = vector.broadcast %cst_64 : f32 to vector<1x128xf32>
    %120 = arith.mulf %119, %101 : vector<1x128xf32>
    %121 = arith.addf %97, %120 : vector<1x128xf32>
    %cst_65 = arith.constant 5.000000e-01 : f32
    %122 = vector.broadcast %cst_65 : f32 to vector<1x128xf32>
    %123 = arith.mulf %122, %103 : vector<1x128xf32>
    %124 = arith.subf %99, %123 : vector<1x128xf32>
    %cst_66 = arith.constant 5.000000e-01 : f32
    %125 = vector.broadcast %cst_66 : f32 to vector<1x128xf32>
    %126 = arith.mulf %125, %103 : vector<1x128xf32>
    %127 = arith.addf %99, %126 : vector<1x128xf32>
    %128 = arith.minimumf %109, %121 : vector<1x128xf32>
    %129 = arith.maximumf %106, %118 : vector<1x128xf32>
    %130 = arith.subf %128, %129 : vector<1x128xf32>
    %cst_67 = arith.constant 0.000000e+00 : f32
    %131 = vector.broadcast %cst_67 : f32 to vector<1x128xf32>
    %132 = arith.maximumf %130, %131 : vector<1x128xf32>
    %133 = arith.minimumf %115, %127 : vector<1x128xf32>
    %134 = arith.maximumf %112, %124 : vector<1x128xf32>
    %135 = arith.subf %133, %134 : vector<1x128xf32>
    %cst_68 = arith.constant 0.000000e+00 : f32
    %136 = vector.broadcast %cst_68 : f32 to vector<1x128xf32>
    %137 = arith.maximumf %135, %136 : vector<1x128xf32>
    %138 = arith.mulf %132, %137 : vector<1x128xf32>
    %139 = arith.subf %109, %106 : vector<1x128xf32>
    %140 = arith.subf %115, %112 : vector<1x128xf32>
    %141 = arith.mulf %139, %140 : vector<1x128xf32>
    %142 = math.absf %141 : vector<1x128xf32>
    %143 = arith.subf %121, %118 : vector<1x128xf32>
    %144 = arith.subf %127, %124 : vector<1x128xf32>
    %145 = arith.mulf %143, %144 : vector<1x128xf32>
    %146 = math.absf %145 : vector<1x128xf32>
    %147 = arith.addf %142, %146 : vector<1x128xf32>
    %148 = arith.subf %147, %138 : vector<1x128xf32>
    %cst_69 = arith.constant 9.99999997E-7 : f32
    %149 = vector.broadcast %cst_69 : f32 to vector<1x128xf32>
    %150 = arith.addf %148, %149 : vector<1x128xf32>
    %151 = tpu.reciprocal %150 {approx = true} : vector<1x128xf32> -> vector<1x128xf32>
    %152 = arith.mulf %150, %151 : vector<1x128xf32>
    %cst_70 = arith.constant 2.000000e+00 : f32
    %153 = vector.broadcast %cst_70 : f32 to vector<1x128xf32>
    %154 = arith.subf %153, %152 : vector<1x128xf32>
    %155 = arith.mulf %151, %154 : vector<1x128xf32>
    %156 = arith.mulf %138, %155 : vector<1x128xf32>
    %157 = arith.mulf %156, %9 : vector<1x128xf32>
    %158 = arith.subf %51, %157 : vector<1x128xf32>
    %159 = arith.mulf %158, %158 : vector<1x128xf32>
    %160 = arith.select %11, %159, %14 : vector<1x128xi1>, vector<1x128xf32>
    %161 = vector.shape_cast %160 : vector<1x128xf32> to vector<1x1x128xf32>
    %cst_71 = arith.constant dense<0.000000e+00> : vector<1xf32>
    %162 = vector.multi_reduction <add>, %161, %cst_71 [1, 2] : vector<1x1x128xf32> to vector<1xf32>
    %163 = vector.shape_cast %162 : vector<1xf32> to vector<1x1x1xf32>
    %164 = vector.extract %163[0, 0, 0] : f32 from vector<1x1x1xf32>
    %165 = vector.broadcast %164 : f32 to vector<1x1xf32>
    %cst_72 = arith.constant 1.000000e+00 : f32
    %cst_73 = arith.constant 0.000000e+00 : f32
    %166 = vector.broadcast %cst_72 : f32 to vector<1x128xf32>
    %167 = vector.broadcast %cst_73 : f32 to vector<1x128xf32>
    %168 = arith.select %11, %166, %167 : vector<1x128xi1>, vector<1x128xf32>
    %169 = vector.shape_cast %168 : vector<1x128xf32> to vector<1x1x128xf32>
    %cst_74 = arith.constant dense<0.000000e+00> : vector<1xf32>
    %170 = vector.multi_reduction <add>, %169, %cst_74 [1, 2] : vector<1x1x128xf32> to vector<1xf32>
    %171 = vector.shape_cast %170 : vector<1xf32> to vector<1x1x1xf32>
    %172 = vector.extract %171[0, 0, 0] : f32 from vector<1x1x1xf32>
    %173 = vector.broadcast %172 : f32 to vector<1x1xf32>
    %174 = vector.broadcast %5 : f32 to vector<1x128xf32>
    %175 = arith.mulf %101, %174 : vector<1x128xf32>
    %cst_75 = arith.constant 1.000000e-16 : f32
    %176 = vector.broadcast %cst_75 : f32 to vector<1x128xf32>
    %177 = arith.addf %176, %175 : vector<1x128xf32>
    %178 = math.log %177 : vector<1x128xf32>
    %179 = vector.broadcast %7 : f32 to vector<1x128xf32>
    %180 = arith.mulf %103, %179 : vector<1x128xf32>
    %cst_76 = arith.constant 1.000000e-16 : f32
    %181 = vector.broadcast %cst_76 : f32 to vector<1x128xf32>
    %182 = arith.addf %181, %180 : vector<1x128xf32>
    %183 = math.log %182 : vector<1x128xf32>
    %184 = arith.subf %68, %97 : vector<1x128xf32>
    %185 = arith.mulf %184, %184 : vector<1x128xf32>
    %186 = arith.subf %85, %99 : vector<1x128xf32>
    %187 = arith.mulf %186, %186 : vector<1x128xf32>
    %188 = arith.addf %185, %187 : vector<1x128xf32>
    %189 = arith.subf %87, %178 : vector<1x128xf32>
    %190 = arith.mulf %189, %189 : vector<1x128xf32>
    %191 = arith.addf %188, %190 : vector<1x128xf32>
    %192 = arith.subf %89, %183 : vector<1x128xf32>
    %193 = arith.mulf %192, %192 : vector<1x128xf32>
    %194 = arith.addf %191, %193 : vector<1x128xf32>
    %195 = arith.select %11, %194, %14 : vector<1x128xi1>, vector<1x128xf32>
    %196 = vector.shape_cast %195 : vector<1x128xf32> to vector<1x1x128xf32>
    %cst_77 = arith.constant dense<0.000000e+00> : vector<1xf32>
    %197 = vector.multi_reduction <add>, %196, %cst_77 [1, 2] : vector<1x1x128xf32> to vector<1xf32>
    %198 = vector.shape_cast %197 : vector<1xf32> to vector<1x1x1xf32>
    %199 = vector.extract %198[0, 0, 0] : f32 from vector<1x1x1xf32>
    %200 = vector.broadcast %199 : f32 to vector<1x1xf32>
    %c0_78 = arith.constant 0 : index
    %c5 = arith.constant 5 : index
    %c0_79 = arith.constant 0 : index
    %c0_80 = arith.constant 0 : index
    %201 = vector.load %arg3[%c0_78, %c5, %c0_79, %c0_80] : memref<1x9x1x128xf32, #tpu.memory_space<vmem>>, vector<1x1x1x128xf32>
    %202 = vector.shape_cast %201 : vector<1x1x1x128xf32> to vector<1x128xf32>
    %c0_81 = arith.constant 0 : index
    %c6 = arith.constant 6 : index
    %c0_82 = arith.constant 0 : index
    %c0_83 = arith.constant 0 : index
    %203 = vector.load %arg3[%c0_81, %c6, %c0_82, %c0_83] : memref<1x9x1x128xf32, #tpu.memory_space<vmem>>, vector<1x1x1x128xf32>
    %204 = vector.shape_cast %203 : vector<1x1x1x128xf32> to vector<1x128xf32>
    %c0_84 = arith.constant 0 : index
    %c7 = arith.constant 7 : index
    %c0_85 = arith.constant 0 : index
    %c0_86 = arith.constant 0 : index
    %205 = vector.load %arg3[%c0_84, %c7, %c0_85, %c0_86] : memref<1x9x1x128xf32, #tpu.memory_space<vmem>>, vector<1x1x1x128xf32>
    %206 = vector.shape_cast %205 : vector<1x1x1x128xf32> to vector<1x128xf32>
    %c0_87 = arith.constant 0 : index
    %c8 = arith.constant 8 : index
    %c0_88 = arith.constant 0 : index
    %c0_89 = arith.constant 0 : index
    %207 = vector.load %arg3[%c0_87, %c8, %c0_88, %c0_89] : memref<1x9x1x128xf32, #tpu.memory_space<vmem>>, vector<1x1x1x128xf32>
    %208 = vector.shape_cast %207 : vector<1x1x1x128xf32> to vector<1x128xf32>
    %209 = arith.maximumf %202, %204 : vector<1x128xf32>
    %210 = arith.maximumf %209, %206 : vector<1x128xf32>
    %211 = arith.maximumf %210, %208 : vector<1x128xf32>
    %212 = arith.subf %202, %211 : vector<1x128xf32>
    %213 = math.exp %212 : vector<1x128xf32>
    %214 = arith.subf %204, %211 : vector<1x128xf32>
    %215 = math.exp %214 : vector<1x128xf32>
    %216 = arith.addf %213, %215 : vector<1x128xf32>
    %217 = arith.subf %206, %211 : vector<1x128xf32>
    %218 = math.exp %217 : vector<1x128xf32>
    %219 = arith.addf %216, %218 : vector<1x128xf32>
    %220 = arith.subf %208, %211 : vector<1x128xf32>
    %221 = math.exp %220 : vector<1x128xf32>
    %222 = arith.addf %219, %221 : vector<1x128xf32>
    %223 = math.log %222 : vector<1x128xf32>
    %224 = arith.addf %211, %223 : vector<1x128xf32>
    %c0_90 = arith.constant 0 : index
    %c5_91 = arith.constant 5 : index
    %c0_92 = arith.constant 0 : index
    %c0_93 = arith.constant 0 : index
    %225 = vector.load %arg4[%c0_90, %c5_91, %c0_92, %c0_93] : memref<1x6x1x128xf32, #tpu.memory_space<vmem>>, vector<1x1x1x128xf32>
    %226 = vector.shape_cast %225 : vector<1x1x1x128xf32> to vector<1x128xf32>
    %cst_94 = arith.constant 0.000000e+00 : f32
    %227 = vector.broadcast %cst_94 : f32 to vector<1x128xf32>
    %228 = arith.cmpf oeq, %226, %227 : vector<1x128xf32>
    %229 = arith.select %228, %202, %14 : vector<1x128xi1>, vector<1x128xf32>
    %cst_95 = arith.constant 1.000000e+00 : f32
    %230 = vector.broadcast %cst_95 : f32 to vector<1x128xf32>
    %231 = arith.cmpf oeq, %226, %230 : vector<1x128xf32>
    %232 = arith.select %231, %204, %14 : vector<1x128xi1>, vector<1x128xf32>
    %233 = arith.addf %229, %232 : vector<1x128xf32>
    %cst_96 = arith.constant 2.000000e+00 : f32
    %234 = vector.broadcast %cst_96 : f32 to vector<1x128xf32>
    %235 = arith.cmpf oeq, %226, %234 : vector<1x128xf32>
    %236 = arith.select %235, %206, %14 : vector<1x128xi1>, vector<1x128xf32>
    %237 = arith.addf %233, %236 : vector<1x128xf32>
    %cst_97 = arith.constant 3.000000e+00 : f32
    %238 = vector.broadcast %cst_97 : f32 to vector<1x128xf32>
    %239 = arith.cmpf oeq, %226, %238 : vector<1x128xf32>
    %240 = arith.select %239, %208, %14 : vector<1x128xi1>, vector<1x128xf32>
    %241 = arith.addf %237, %240 : vector<1x128xf32>
    %242 = arith.subf %224, %241 : vector<1x128xf32>
    %243 = arith.select %11, %242, %14 : vector<1x128xi1>, vector<1x128xf32>
    %244 = vector.shape_cast %243 : vector<1x128xf32> to vector<1x1x128xf32>
    %cst_98 = arith.constant dense<0.000000e+00> : vector<1xf32>
    %245 = vector.multi_reduction <add>, %244, %cst_98 [1, 2] : vector<1x1x128xf32> to vector<1xf32>
    %246 = vector.shape_cast %245 : vector<1xf32> to vector<1x1x1xf32>
    %247 = vector.extract %246[0, 0, 0] : f32 from vector<1x1x1xf32>
    %248 = vector.broadcast %247 : f32 to vector<1x1xf32>
    %249 = tpu.iota {dimensions = array<i32: 1>} : vector<8x128xi32>
    %c0_i32 = arith.constant 0 : i32
    %250 = vector.broadcast %c0_i32 : i32 to vector<8x128xi32>
    %251 = arith.cmpi eq, %249, %250 : vector<8x128xi32>
    %cst_99 = arith.constant 0.000000e+00 : f32
    %252 = vector.shape_cast %32 : vector<1x1xf32> to vector<1x1xf32>
    %253 = vector.broadcast %252 : vector<1x1xf32> to vector<8x128xf32>
    %254 = vector.broadcast %cst_99 : f32 to vector<8x128xf32>
    %255 = arith.select %251, %253, %254 : vector<8x128xi1>, vector<8x128xf32>
    %c1_i32 = arith.constant 1 : i32
    %256 = vector.broadcast %c1_i32 : i32 to vector<8x128xi32>
    %257 = arith.cmpi eq, %249, %256 : vector<8x128xi32>
    %cst_100 = arith.constant 0.000000e+00 : f32
    %258 = vector.shape_cast %40 : vector<1x1xf32> to vector<1x1xf32>
    %259 = vector.broadcast %258 : vector<1x1xf32> to vector<8x128xf32>
    %260 = vector.broadcast %cst_100 : f32 to vector<8x128xf32>
    %261 = arith.select %257, %259, %260 : vector<8x128xi1>, vector<8x128xf32>
    %262 = arith.addf %255, %261 : vector<8x128xf32>
    %c2_i32 = arith.constant 2 : i32
    %263 = vector.broadcast %c2_i32 : i32 to vector<8x128xi32>
    %264 = arith.cmpi eq, %249, %263 : vector<8x128xi32>
    %cst_101 = arith.constant 0.000000e+00 : f32
    %265 = vector.shape_cast %165 : vector<1x1xf32> to vector<1x1xf32>
    %266 = vector.broadcast %265 : vector<1x1xf32> to vector<8x128xf32>
    %267 = vector.broadcast %cst_101 : f32 to vector<8x128xf32>
    %268 = arith.select %264, %266, %267 : vector<8x128xi1>, vector<8x128xf32>
    %269 = arith.addf %262, %268 : vector<8x128xf32>
    %c3_i32 = arith.constant 3 : i32
    %270 = vector.broadcast %c3_i32 : i32 to vector<8x128xi32>
    %271 = arith.cmpi eq, %249, %270 : vector<8x128xi32>
    %cst_102 = arith.constant 0.000000e+00 : f32
    %272 = vector.shape_cast %173 : vector<1x1xf32> to vector<1x1xf32>
    %273 = vector.broadcast %272 : vector<1x1xf32> to vector<8x128xf32>
    %274 = vector.broadcast %cst_102 : f32 to vector<8x128xf32>
    %275 = arith.select %271, %273, %274 : vector<8x128xi1>, vector<8x128xf32>
    %276 = arith.addf %269, %275 : vector<8x128xf32>
    %c4_i32 = arith.constant 4 : i32
    %277 = vector.broadcast %c4_i32 : i32 to vector<8x128xi32>
    %278 = arith.cmpi eq, %249, %277 : vector<8x128xi32>
    %cst_103 = arith.constant 0.000000e+00 : f32
    %279 = vector.shape_cast %200 : vector<1x1xf32> to vector<1x1xf32>
    %280 = vector.broadcast %279 : vector<1x1xf32> to vector<8x128xf32>
    %281 = vector.broadcast %cst_103 : f32 to vector<8x128xf32>
    %282 = arith.select %278, %280, %281 : vector<8x128xi1>, vector<8x128xf32>
    %283 = arith.addf %276, %282 : vector<8x128xf32>
    %c5_i32 = arith.constant 5 : i32
    %284 = vector.broadcast %c5_i32 : i32 to vector<8x128xi32>
    %285 = arith.cmpi eq, %249, %284 : vector<8x128xi32>
    %cst_104 = arith.constant 0.000000e+00 : f32
    %286 = vector.shape_cast %248 : vector<1x1xf32> to vector<1x1xf32>
    %287 = vector.broadcast %286 : vector<1x1xf32> to vector<8x128xf32>
    %288 = vector.broadcast %cst_104 : f32 to vector<8x128xf32>
    %289 = arith.select %285, %287, %288 : vector<8x128xi1>, vector<8x128xf32>
    %290 = arith.addf %283, %289 : vector<8x128xf32>
    %291 = vector.shape_cast %290 : vector<8x128xf32> to vector<1x1x8x128xf32>
    %c0_105 = arith.constant 0 : index
    %c0_106 = arith.constant 0 : index
    %c0_107 = arith.constant 0 : index
    %c0_108 = arith.constant 0 : index
    %292 = vector.load %arg5[%c0_105, %c0_106, %c0_107, %c0_108] : memref<1x1x8x128xf32, #tpu.memory_space<vmem>>, vector<1x1x8x128xf32>
    tpu.vector_store %arg5[%c0_105, %c0_106, %c0_107, %c0_108], %291 {strides = array<i32>} : memref<1x1x8x128xf32, #tpu.memory_space<vmem>>, vector<1x1x8x128xf32>,
    return
  }
  func.func @transform_0(%arg0: i32, %arg1: i32) -> (i32, i32) {
    %c0_i32 = arith.constant 0 : i32
    %c0_i32_0 = arith.constant 0 : i32
    %c0_i32_1 = arith.constant 0 : i32
    return %c0_i32, %c0_i32_0 : i32, i32
  }
  func.func @transform_1(%arg0: i32, %arg1: i32) -> (i32, i32, i32, i32) {
    %c0_i32 = arith.constant 0 : i32
    %c0_i32_0 = arith.constant 0 : i32
    %c0_i32_1 = arith.constant 0 : i32
    return %arg0, %c0_i32, %arg1, %c0_i32_0 : i32, i32, i32, i32
  }
  func.func @transform_2(%arg0: i32, %arg1: i32) -> (i32, i32, i32, i32) {
    %c0_i32 = arith.constant 0 : i32
    %c0_i32_0 = arith.constant 0 : i32
    %c0_i32_1 = arith.constant 0 : i32
    return %arg0, %c0_i32, %arg1, %c0_i32_0 : i32, i32, i32, i32
  }
  func.func @transform_3(%arg0: i32, %arg1: i32) -> (i32, i32, i32, i32) {
    %c0_i32 = arith.constant 0 : i32
    %c0_i32_0 = arith.constant 0 : i32
    %c0_i32_1 = arith.constant 0 : i32
    return %arg0, %arg1, %c0_i32, %c0_i32_0 : i32, i32, i32, i32
  }
}

</mosaic_0001>

<bundles_post_ra>
// kernel: yolo_loss_pallas.1
= control target key start
LH: loop header
LB: loop body
LE: loop exit
PB: predicated region body
PF: predicated region fallthrough
CT: control target
= control target key end

     0   :  { %8 = vsyncpa [#allocation3], 0  ;;  %s787_s12 = smov 0   ;;  %s789_s13 = smov 0   ;;  %s1004_s0 = inlined_call_operand.vmem [shape: f32[3,4], index: 0, kind: input, shape index: {}]   ;;  %s1005_s1 = inlined_call_operand.vmem [shape: f32[3,9,1,128], index: 1, kind: input, shape index: {}]   ;;  %s1006_s2 = inlined_call_operand.vmem [shape: f32[3,6,1,128], index: 2, kind: input, shape index: {}]   ;;  %s1007_s3 = inlined_call_operand.vmem [shape: f32[3,1,8,128], index: 3, kind: output, shape index: {}]  }
   0x1   :  { %s791_s14 = smov 0  }
   0x2 LB: > { %s614_s15 = sadd.s32 4294967295, %s763_s14   ;;  %s26_s16 = sadd.s32 1, %s759_s13  ;;  %s763_s14 = sphi %s791_s14, %s14_s14   ;;  %s759_s13 = sphi %s789_s13, %s1011_s13   ;;  %s755_s12 = sphi %s787_s12, %s1010_s12  }
   0x3   : > { %p28_p0 = scmp.ge.s32.totalorder %s26_s16, 3  ;;  %p616_p1 = scmp.ge.s32.totalorder %s763_s14, 1 }
   0x4   : > { %p136_p2 = scmp.lt.s32.totalorder %s763_s14, 4  ;;  %p812_p4 = scmp.eq.s32.totalorder %s614_s15, 0 }
   0x5   : > { %s1013_s16 = smov (%p28_p0, %s26_s16), 0  ;;  %s149_s21 = sshll.u32 %s1004_s0, 4  ;;  %s150_s21 = int_to_ptr.vmem [resolvable:$true] %s149_s21 }
   0x6   : > { %p808_p3 = pnand %p616_p1, %p136_p2  ;;  %s722_s22 = scalar_lea.vmem %s150_s21, 64 }
   0x7   : > { %p723_p7 = scmp.ne.s32.totalorder %s150_s21, %s722_s22  ;;  %p730_p11 = scmp.lt.s32.totalorder %s150_s21, %s150_s21 }
   0x8   : > { %p656_p5 = pneg %p808_p3  ;;  %p731_p12 = scmp.lt.s32.totalorder %s722_s22, %s722_s22 }
   0xa   : > { %p657_p6 = pnand %p812_p4, %p656_p5  ;;  %p732_p13 = por %p731_p12, %p730_p11 }
   0xc   : > { %p724_p8 = pneg %p657_p6 }
   0xe   : > { %p725_p9 = pnand %p724_p8, %p723_p7 }
  0x10   : > { %p726_p10 = pneg %p725_p9 }
  0x12   : > { %p733_p0 = pnand %p732_p13, %p726_p10 }
  0x14   : > { %736 = shalt.err (!%p733_p0)
}
  0x15   : > { %s765_s23 = smov [#allocation2]   ;;  %182 = sbr.rel (%p808_p3) target bundleno = 338 (0x152), region = 32 }
  0x16   : > { %659 = dma.vmem_to_smem (!%p657_p6), %s150_s21, 64, %s765_s23, [#allocation3]  }
  0x1c   : > { %750 = dma.done.wait (%p812_p4), [#allocation3], 64  }
  0x1d   : > { %752 = vsyncadd (%p812_p4), [#allocation3], 4294967232 }
  0x1e   : > { %188 = sfence }
  0x1f   : > { %p218_p1 = scmp.lt.s32.totalorder %s755_s12, 2  ;;  %s831_s24 = sshll.u32 %s755_s12, 7  ;;  %vm261_vm1 = vcmask 1040384   ;;  %v766_v52 = vmov 0.0  }
  0x20   : > { %s243_s25 = sadd.s32 2, %s831_s24  ;;  %s245_s4 = sadd.s32 3, %s831_s24 }
  0x21   : > { %s1015_s12 = smov (!%p218_p1, %s755_s12), 2  ;;  %s244_s30 = sld [smem:[#allocation2 + %s243_s25]] }
  0x22   : > { %s638_s26 = smul.u32 9, %s1015_s12  ;;  %s246_s6 = sld [smem:[#allocation2 + %s245_s4]] }
  0x23   : > { %s639_s5 = smul.u32 6, %s1015_s12  ;;  %s241_s10 = sadd.s32 1, %s831_s24 }
  0x24   : > { %s841_s29 = scalar_lea.vmem %s1005_s1, %s638_s26  ;;  %s898_s11 = sld [smem:[#allocation2 + %s831_s24]] }
  0x25   : > { %v844_v0 = vld [vmem:[%s841_s29] sm:$0x1]  ;;  %v847_v1 = vld [vmem:[%s841_s29 + $0x1] sm:$0x1]  ;;  %v850_v2 = vld [vmem:[%s841_s29 + $0x2] sm:$0x1]  ;;  %s860_s9 = scalar_lea.vmem %s1006_s2, %s639_s5 }
  0x26   : > { %v251_v3 = vand.u32 2147483647, %v844_v0  ;;  %v292_v4 = vand.u32 2147483647, %v847_v1  ;;  %v306_v6 = vand.u32 2147483647, %v850_v2 }
  0x27   : > { %v400_v12 = vstv %s244_s30  ;;  %v863_v13 = vld [vmem:[%s841_s29 + $0x3] sm:$0x1]  ;;  %v867_v15 = vld [vmem:[%s841_s29 + $0x4] sm:$0x1]  ;;  %v870_v17 = vld [vmem:[%s841_s29 + $0x5] sm:$0x1] }
  0x28   : > { %v252_v5 = vsub.f32 0.0, %v251_v3  ;;  %v293_v7 = vsub.f32 0.0, %v292_v4  ;;  %v307_v9 = vsub.f32 0.0, %v306_v6  ;;  %v629_v14 = vld [vmem:[%s860_s9 + $0x3] sm:$0x1]  ;;  %v405_v20 = vstv %s246_s6  ;;  %s900_s15 = sld [smem:[#allocation2 + %s241_s10]] }
  0x29   : > { %v401_v16 = vmul.f32 %v629_v14, %v400_v12  ;;  %v873_v18 = vld [vmem:[%s841_s29 + $0x6] sm:$0x1]  ;;  %v322_v19 = vmul.f32 1.442695, %v863_v13  ;;  %v326_v21 = vmul.f32 1.442695, %v867_v15 }
  0x2a   : > { %v253_v8 = vmul.f32 1.442695, %v252_v5  ;;  %v294_v10 = vmul.f32 1.442695, %v293_v7  ;;  %v308_v11 = vmul.f32 1.442695, %v307_v9  ;;  %v440_v24 = vmax.f32 %v870_v17, %v873_v18 }
  0x2b   : > { %v630_v22 = vld [vmem:[%s860_s9 + $0x4] sm:$0x1]  ;;  %v402_v23 = vadd.f32 1e-16, %v401_v16  ;;  %v881_v26 = vld [vmem:[%s841_s29 + $0x7] sm:$0x1]  ;;  %v324_v50 = vstv %s898_s11 }
  0x2c   : > { %688 = vpow2.f32 %v253_v8  ;;  %v406_v25 = vmul.f32 %v630_v22, %v405_v20  ;;  %v441_v32 = vmax.f32 %v440_v24, %v881_v26  ;;  %v895_v35 = vld [vmem:[%s841_s29 + $0x8] sm:$0x1]  ;;  %v344_v37 = vmul.f32 0.5, %v629_v14  ;;  %v906_v38 = vld [vmem:[%s860_s9 + $0x1] sm:$0x1]  ;;  %s621_s22 = sshll.u32 %s1015_s12, 3 }
  0x2d   : > { %690 = vpow2.f32 %v294_v10  ;;  %v909_v39 = vld [vmem:[%s860_s9] sm:$0x1]  ;;  %v347_v41 = vmul.f32 0.5, %v630_v22  ;;  %v914_v44 = vld [vmem:[%s860_s9 + $0x2] sm:$0x1]  ;;  %v255_v49 = vmax.f32 %v844_v0, 0.0  ;;  %s238_s26 = scalar_lea.vmem %s1007_s3, %s621_s22 }
  0x2e   : > { %692 = vpow2.f32 %v308_v11  ;;  %v407_v34 = vadd.f32 1e-16, %v406_v25  ;;  %v903_v36 = vmax.f32 %v441_v32, %v895_v35  ;;  %v917_v45 = vsub.f32 %v906_v38, %v344_v37 }
  0x2f   : > { %694 = vpow2.f32 %v322_v19  ;;  %v920_v46 = vadd.f32 %v906_v38, %v344_v37  ;;  %vm249_vm0 = vcmp.eq.f32.partialorder %v909_v39, 0.0  ;;  %vm287_vm2 = vcmp.ge.f32.partialorder %v844_v0, 0.0 }
  0x30   : > { %696 = vpow2.f32 %v326_v21  ;;  %v443_v42 = vsub.f32 %v870_v17, %v903_v36  ;;  %v446_v47 = vsub.f32 %v873_v18, %v903_v36  ;;  %v272_v53 = vsel %vm249_vm0, 1.0, %v766_v52 }
  0x31   : > { %698 = vlog2.f32 %v402_v23  ;;  %vm301_vm3 = vcmp.ge.f32.partialorder %v847_v1, 0.0  ;;  %v450_v54 = vsub.f32 %v881_v26, %v903_v36  ;;  %v328_v57 = vstv %s900_s15 }
  0x32   : > { %v936_v58 = vsub.f32 %v914_v44, %v347_v41  ;;  %v444_v59 = vmul.f32 1.442695, %v443_v42  ;;  %v939_v62 = vadd.f32 %v914_v44, %v347_v41  ;;  %v363_v63 = vsub.f32 %v920_v46, %v917_v45 }
  0x33   : > { %v447_v3 = vmul.f32 1.442695, %v446_v47  ;;  %v454_v8 = vsub.f32 %v895_v35, %v903_v36  ;;  %v451_v14 = vmul.f32 1.442695, %v450_v54  ;;  %v273_v32 = vsel %vm261_vm1, %v272_v53, 0.0 }
  0x34   : > { %v364_v25 = vsub.f32 %v939_v62, %v936_v58  ;;  %vm315_vm4 = vcmp.ge.f32.partialorder %v850_v2, 0.0  ;;  %vm248_vm5 = vcmp.eq.f32.partialorder %v909_v39, 1.0 }
  0x35   : > { %v455_v42 = vmul.f32 1.442695, %v454_v8 }
  0x36   : > { %v883_v27 = vpop.eup %688 }
  0x37   : > { %v885_v28 = vpop.eup %690  ;;  %v256_v29 = vadd.f32 1.0, %v883_v27 }
  0x38   : > { %v888_v30 = vpop.eup %692  ;;  %v296_v31 = vadd.f32 1.0, %v885_v28 }
  0x39   : > { %700 = vlog2.f32 %v256_v29  ;;  %v310_v33 = vadd.f32 1.0, %v888_v30  ;;  %v695_v40 = vpop.eup %694 }
  0x3a   : > { %702 = vrcp.f32 %v256_v29  ;;  %v697_v43 = vpop.eup %696  ;;  %v325_v12 = vmul.f32 %v695_v40, %v324_v50 }
  0x3b   : > { %704 = vrcp.f32 %v296_v31  ;;  %v699_v48 = vpop.eup %698  ;;  %v329_v20 = vmul.f32 %v697_v43, %v328_v57 }
  0x3c   : > { %706 = vrcp.f32 %v310_v33  ;;  %v404_v7 = vmul.f32 0.6931472, %v699_v48  ;;  %v338_v37 = vmul.f32 0.5, %v325_v12 }
  0x3d   : > { %708 = vlog2.f32 %v407_v34  ;;  %v341_v41 = vmul.f32 0.5, %v329_v20 }
  0x3e   : > { %710 = vpow2.f32 %v444_v59 }
  0x3f   : > { %712 = vpow2.f32 %v447_v3 }
  0x40   : > { %714 = vpow2.f32 %v451_v14 }
  0x41   : > { %716 = vpow2.f32 %v455_v42 }
  0x43   : > { %v701_v51 = vpop.eup %700 }
  0x44   : > { %v703_v55 = vpop.eup %702  ;;  %v258_v56 = vmul.f32 0.6931472, %v701_v51 }
  0x45   : > { %v705_v60 = vpop.eup %704  ;;  %v284_v61 = vmul.f32 %v703_v55, %v256_v29 }
  0x46   : > { %v707_v4 = vpop.eup %706  ;;  %v259_v5 = vadd.f32 %v258_v56, %v255_v49  ;;  %v298_v6 = vmul.f32 %v705_v60, %v296_v31  ;;  %v415_v31 = vsub.f32 %v863_v13, %v404_v7 }
  0x47   : > { %v709_v9 = vpop.eup %708  ;;  %v285_v10 = vsub.f32 2.0, %v284_v61  ;;  %v312_v11 = vmul.f32 %v707_v4, %v310_v33 }
  0x48   : > { %v260_v16 = vsel %vm249_vm0, %v259_v5, 0.0  ;;  %v299_v19 = vsub.f32 2.0, %v298_v6  ;;  %v409_v29 = vmul.f32 0.6931472, %v709_v9  ;;  %v416_v48 = vmul.f32 %v415_v31, %v415_v31  ;;  %v711_v57 = vpop.eup %710 }
  0x49   : > { %v262_v21 = vsel %vm261_vm1, %v260_v16, 0.0  ;;  %v286_v22 = vmul.f32 %v703_v55, %v285_v10  ;;  %v313_v23 = vsub.f32 2.0, %v312_v11 }
  0x4a   : > { %263 = vadd.xlane.f32.xlu0 %v262_v21  ;;  %v300_v24 = vmul.f32 %v705_v60, %v299_v19  ;;  %v418_v49 = vsub.f32 %v867_v15, %v409_v29 }
  0x4b   : > { %v288_v33 = vmul.f32 %v883_v27, %v286_v22  ;;  %v314_v34 = vmul.f32 %v707_v4, %v313_v23  ;;  %v365_v27 = vmul.f32 %v364_v25, %v363_v63  ;;  %v713_v63 = vpop.eup %712  ;;  %v635_v23 = vld [vmem:[%s860_s9 + $0x5] sm:$0x1] }
  0x4c   : > { %v302_v40 = vmul.f32 %v885_v28, %v300_v24  ;;  %v419_v6 = vmul.f32 %v418_v49, %v418_v49  ;;  %v449_v9 = vadd.f32 %v713_v63, %v711_v57  ;;  %v715_v10 = vpop.eup %714  ;;  %vm463_vm6 = vcmp.eq.f32.partialorder %v635_v23, 0.0 }
  0x4d   : > { %v957_v43 = vsel %vm287_vm2, %v286_v22, %v288_v33  ;;  %v316_v47 = vmul.f32 %v888_v30, %v314_v34  ;;  %v366_v3 = vand.u32 2147483647, %v365_v27  ;;  %v717_v12 = vpop.eup %716  ;;  %vm465_vm7 = vcmp.eq.f32.partialorder %v635_v23, 1.0 }
  0x4e   : > { %274 = vadd.xlane.f32.xlu0 %v273_v32  ;;  %v303_v13 = vsel %vm301_vm3, %v300_v24, %v302_v40  ;;  %v453_v19 = vadd.f32 %v715_v10, %v449_v9  ;;  %v464_v25 = vsel %vm463_vm6, %v870_v17, 0.0  ;;  %v466_v29 = vsel %vm465_vm7, %v873_v18, 0.0 }
  0x4f   : > { %v317_v28 = vsel %vm315_vm4, %v314_v34, %v316_v47  ;;  %v339_v50 = vsub.f32 %v303_v13, %v338_v37  ;;  %v340_v2 = vadd.f32 %v338_v37, %v303_v13  ;;  %v410_v51 = vsub.f32 %v303_v13, %v906_v38 }
  0x50   : > { %v342_v53 = vsub.f32 %v317_v28, %v341_v41  ;;  %v343_v0 = vadd.f32 %v341_v41, %v317_v28  ;;  %v412_v54 = vsub.f32 %v317_v28, %v914_v44  ;;  %v457_v22 = vadd.f32 %v717_v12, %v453_v19 }
  0x51   : > { %v350_v30 = vmin.f32 %v340_v2, %v920_v46  ;;  %v351_v55 = vmax.f32 %v339_v50, %v917_v45  ;;  %v359_v1 = vsub.f32 %v340_v2, %v339_v50  ;;  %v411_v56 = vmul.f32 %v410_v51, %v410_v51 }
  0x52   : > { %v354_v59 = vmin.f32 %v343_v0, %v939_v62  ;;  %v355_v15 = vmax.f32 %v342_v53, %v936_v58  ;;  %v360_v60 = vsub.f32 %v343_v0, %v342_v53  ;;  %v413_v61 = vmul.f32 %v412_v54, %v412_v54 }
  0x53   : > { %v352_v38 = vsub.f32 %v350_v30, %v351_v55  ;;  %vm468_vm8 = vcmp.eq.f32.partialorder %v635_v23, 2.0  ;;  %v467_v33 = vadd.f32 %v466_v29, %v464_v25  ;;  %vm471_vm9 = vcmp.eq.f32.partialorder %v635_v23, 3.0 }
  0x54   : > { %v356_v4 = vsub.f32 %v354_v59, %v355_v15  ;;  %v361_v5 = vmul.f32 %v360_v60, %v359_v1  ;;  %v414_v44 = vadd.f32 %v413_v61, %v411_v56  ;;  %v469_v37 = vsel %vm468_vm8, %v881_v26, 0.0 }
  0x55   : > { %v353_v7 = vmax.f32 %v352_v38, 0.0  ;;  %v470_v47 = vadd.f32 %v469_v37, %v467_v33  ;;  %v472_v13 = vsel %vm471_vm9, %v895_v35, 0.0  ;;  %v389_v26 = vsel %vm248_vm5, 1.0, %v766_v52 }
  0x56   : > { %v357_v46 = vmax.f32 %v356_v4, 0.0  ;;  %v362_v8 = vand.u32 2147483647, %v361_v5  ;;  %v417_v45 = vadd.f32 %v416_v48, %v414_v44  ;;  %v390_v35 = vsel %vm261_vm1, %v389_v26, 0.0 }
  0x57   : > { %v473_v48 = vadd.f32 %v472_v13, %v470_v47 }
  0x58   : > { %v358_v62 = vmul.f32 %v357_v46, %v353_v7  ;;  %v367_v58 = vadd.f32 %v366_v3, %v362_v8  ;;  %v420_v11 = vadd.f32 %v419_v6, %v417_v45 }
  0x5a   : > { %v368_v14 = vsub.f32 %v367_v58, %v358_v62  ;;  %v421_v16 = vsel %vm248_vm5, %v420_v11, 0.0 }
  0x5b   : > { %v422_v20 = vsel %vm261_vm1, %v421_v16, 0.0 }
  0x5c   : > { %v369_v21 = vadd.f32 1e-06, %v368_v14  ;;  %423 = vadd.xlane.f32.xlu0 %v422_v20 }
  0x5e   : > { %718 = vrcp.f32 %v369_v21 }
  0x5f   : > { %720 = vlog2.f32 %v457_v22 }
  0x68   : > { %v719_v24 = vpop.eup %718 }
  0x69   : > { %v371_v31 = vmul.f32 %v719_v24, %v369_v21  ;;  %v721_v34 = vpop.eup %720 }
  0x6a   : > { %v459_v42 = vmul.f32 0.6931472, %v721_v34 }
  0x6b   : > { %v372_v32 = vsub.f32 2.0, %v371_v31  ;;  %v486_v31 = vlaneseq }
  0x6c   : > { %v460_v18 = vadd.f32 %v459_v42, %v903_v36 }
  0x6d   : > { %v373_v40 = vmul.f32 %v719_v24, %v372_v32  ;;  %v487_v32 = vand.u32 127, %v486_v31 }
  0x6e   : > { %v474_v50 = vsub.f32 %v460_v18, %v473_v48 }
  0x6f   : > { %v374_v41 = vmul.f32 %v373_v40, %v358_v62  ;;  %vm488_vm10 = vcmp.eq.s32.totalorder %v487_v32, 0  ;;  %vm491_vm11 = vcmp.eq.s32.totalorder %v487_v32, 1  ;;  %vm495_vm12 = vcmp.eq.s32.totalorder %v487_v32, 2 }
  0x70   : > { %vm499_vm13 = vcmp.eq.s32.totalorder %v487_v32, 3  ;;  %vm503_vm14 = vcmp.eq.s32.totalorder %v487_v32, 4  ;;  %vm507_vm15 = vcmp.eq.s32.totalorder %v487_v32, 5 }
  0x71   : > { %v375_v27 = vmul.f32 %v374_v41, %v909_v39 }
  0x73   : > { %v376_v17 = vsub.f32 %v957_v43, %v375_v27  ;;  %v475_v43 = vsel %vm248_vm5, %v474_v50, 0.0 }
  0x74   : > { %v476_v36 = vsel %vm261_vm1, %v475_v43, 0.0 }
  0x75   : > { %v377_v49 = vmul.f32 %v376_v17, %v376_v17 }
  0x77   : > { %v378_v28 = vsel %vm248_vm5, %v377_v49, 0.0 }
  0x78   : > { %v379_v2 = vsel %vm261_vm1, %v378_v28, 0.0 }
  0x79   : > { %380 = vadd.xlane.f32.xlu1 %v379_v2 }
  0x7d   : > { %391 = vadd.xlane.f32.xlu1 %v390_v35 }
  0x81   : > { %477 = vadd.xlane.f32.xlu1 %v476_v36 }
  0xd7   : > { %v264_v51 = vpop.xlane.xlu0 %263 }
  0xd8   : > { %v265_v53 = vrot.slane %v264_v51, 4 }
  0xda   : > { %v266_v0 = vadd.f32 %v265_v53, %v264_v51 }
  0xdb   : > { %v275_v54 = vpop.xlane.xlu0 %274 }
  0xdc   : > { %v267_v30 = vrot.slane %v266_v0, 2  ;;  %v276_v55 = vrot.slane %v275_v54, 4 }
  0xde   : > { %v277_v52 = vadd.f32 %v276_v55, %v275_v54  ;;  %v268_v1 = vadd.f32 %v267_v30, %v266_v0 }
  0xe0   : > { %v278_v56 = vrot.slane %v277_v52, 2  ;;  %v269_v57 = vrot.slane %v268_v1, 1 }
  0xe2   : > { %v270_v59 = vadd.f32 %v269_v57, %v268_v1  ;;  %v279_v15 = vadd.f32 %v278_v56, %v277_v52 }
  0xe4   : > { %640 = vpush %v270_v59  ;;  %v280_v60 = vrot.slane %v279_v15, 1 }
  0xe6   : > { %v281_v39 = vadd.f32 %v280_v60, %v279_v15 }
  0xe8   : > { %642 = vpush %v281_v39 }
  0xe9   : > { %v424_v61 = vpop.xlane.xlu0 %423 }
  0xea   : > { %v425_v63 = vrot.slane %v424_v61, 4 }
  0xec   : > { %v426_v3 = vadd.f32 %v425_v63, %v424_v61 }
  0xee   : > { %v427_v44 = vrot.slane %v426_v3, 2 }
  0xf0   : > { %v428_v9 = vadd.f32 %v427_v44, %v426_v3 }
  0xf2   : > { %v429_v19 = vrot.slane %v428_v9, 1 }
  0xf4   : > { %v430_v24 = vadd.f32 %v429_v19, %v428_v9 }
 0x106   : > { %v381_v38 = vpop.xlane.xlu1 %380 }
 0x107   : > { %v382_v4 = vrot.slane %v381_v38, 4 }
 0x109   : > { %v383_v5 = vadd.f32 %v382_v4, %v381_v38 }
 0x10a   : > { %v392_v6 = vpop.xlane.xlu1 %391 }
 0x10b   : > { %v384_v7 = vrot.slane %v383_v5, 2  ;;  %v393_v46 = vrot.slane %v392_v6, 4 }
 0x10d   : > { %v394_v8 = vadd.f32 %v393_v46, %v392_v6  ;;  %v385_v45 = vadd.f32 %v384_v7, %v383_v5 }
 0x10e   : > { %v478_v10 = vpop.xlane.xlu1 %477 }
 0x10f   : > { %v395_v62 = vrot.slane %v394_v8, 2  ;;  %v479_v58 = vrot.slane %v478_v10, 4  ;;  %v386_v11 = vrot.slane %v385_v45, 1 }
 0x111   : > { %v480_v12 = vadd.f32 %v479_v58, %v478_v10  ;;  %v387_v14 = vadd.f32 %v386_v11, %v385_v45  ;;  %v396_v16 = vadd.f32 %v395_v62, %v394_v8 }
 0x113   : > { %v481_v20 = vrot.slane %v480_v12, 2  ;;  %644 = vpush %v387_v14  ;;  %v397_v21 = vrot.slane %v396_v16, 1 }
 0x115   : > { %v482_v22 = vadd.f32 %v481_v20, %v480_v12  ;;  %v398_v23 = vadd.f32 %v397_v21, %v396_v16  ;;  %s641_s17 = spop %640 }
 0x116   : > { %v489_v33 = vstv %s641_s17 }
 0x117   : > { %646 = vpush %v398_v23  ;;  %v483_v25 = vrot.slane %v482_v22, 1  ;;  %v490_v37 = vsel %vm488_vm10, %v489_v33, 0.0 }
 0x118   : > { %648 = vpush %v430_v24 }
 0x119   : > { %v484_v29 = vadd.f32 %v483_v25, %v482_v22  ;;  %s643_s18 = spop %642 }
 0x11a   : > { %v492_v34 = vstv %s643_s18 }
 0x11b   : > { %650 = vpush %v484_v29  ;;  %v493_v40 = vsel %vm491_vm11, %v492_v34, 0.0 }
 0x11c   : > { %v494_v47 = vadd.f32 %v493_v40, %v490_v37 }
 0x144   : > { %s645_s19 = spop %644 }
 0x145   : > { %v496_v41 = vstv %s645_s19 }
 0x146   : > { %v497_v42 = vsel %vm495_vm12, %v496_v41, 0.0 }
 0x147   : > { %v498_v13 = vadd.f32 %v497_v42, %v494_v47 }
 0x148   : > { %s647_s20 = spop %646 }
 0x149   : > { %v500_v27 = vstv %s647_s20  ;;  %s649_s21 = spop %648 }
 0x14a   : > { %v501_v17 = vsel %vm499_vm13, %v500_v27, 0.0  ;;  %v504_v18 = vstv %s649_s21 }
 0x14b   : > { %v502_v48 = vadd.f32 %v501_v17, %v498_v13  ;;  %v505_v49 = vsel %vm503_vm14, %v504_v18, 0.0 }
 0x14c   : > { %s651_s23 = spop %650 }
 0x14d   : > { %v506_v28 = vadd.f32 %v505_v49, %v502_v48  ;;  %v508_v26 = vstv %s651_s23 }
 0x14e   : > { %v509_v50 = vsel %vm507_vm15, %v508_v26, 0.0 }
 0x14f   : > { %v510_v2 = vadd.f32 %v509_v50, %v506_v28 }
 0x151   : > { %511 = vst [vmem:[%s238_s26] sm:$0xff] %v510_v2 }
 0x152 PF: > { %s14_s14 = sadd.s32 1, %s763_s14   ;;  %s1010_s12 = smov %s759_s13 }
 0x153   : > { %p11_p2 = scmp.ge.s32.totalorder %s14_s14, 5   ;;  %s1011_s13 = smov %s1013_s16 }
 0x155   :  { %13 = sbr.rel (!%p11_p2) target bundleno = 2 (0x2), region = 83 }
 0x15c   :  { %537 = vsyncpa [#allocation3], 1 }
 0x15d   :  { %539 = vsyncpa [#allocation3 + $0x1], 1 }

</bundles_post_ra>
